<compile_context>
chip_gen: v7x
topology: tpu7x:2x2x1
jax: 0.10.0
libtpu: 0.0.40
codegen_flags: <defaults>
</compile_context>

<pallas_src>
import jax
import jax.numpy as jnp
from jax.experimental import pallas as pl
from jax.experimental.pallas import tpu as pltpu


def _siamese_head_kernel(x1_ref, x2_ref, w1a_ref, w1b_ref, b1_ref,
                         w2_ref, b2_ref, out_ref):
    # layers[0]: combine Linear — two MXU dots, f32 accumulation.
    h = jnp.dot(x1_ref[...], w1a_ref[...], preferred_element_type=jnp.float32)
    h = h + jnp.dot(x2_ref[...], w1b_ref[...],
                    preferred_element_type=jnp.float32)
    # bias + layers[1]: ReLU (VPU)
    h = jnp.maximum(h + b1_ref[...], 0.0)
    # layers[2]: Linear(H -> O) — keep h in f32 (MXU accepts f32 LHS; kernel
    # is memory-bound so the extra passes are free and accuracy improves).
    out_ref[...] = (jnp.dot(h, w2_ref[...],
                            preferred_element_type=jnp.float32)
                    + b2_ref[...])


def _round_up(n, m):
    return ((n + m - 1) // m) * m


def two_input_sequential(x1, x2, w1a, w1b, b1, w2, b2, *, tb=1024):
    """Fused forward of the siamese TwoInputSequential head (f32)."""
    B, D = x1.shape
    H = w1a.shape[1]
    O = w2.shape[1]

    b1 = b1.reshape(1, H).astype(jnp.float32)
    b2 = b2.reshape(1, O).astype(jnp.float32)
    x1 = x1.astype(jnp.float32)
    x2 = x2.astype(jnp.float32)
    w1a = w1a.astype(jnp.float32)
    w1b = w1b.astype(jnp.float32)
    w2 = w2.astype(jnp.float32)

    # Batch tile: as large as the batch allows (per-step overhead dominates at
    # small tiles), but keep >=2 parallel grid steps when B is big enough so
    # both v7x TensorCores get work.
    TB = min(tb, _round_up(B, 8))
    if B >= 256:
        TB = min(TB, max(128, _round_up(pl.cdiv(B, 2), 128)))
    grid = (pl.cdiv(B, TB),)

    flops = 2 * B * (2 * D * H + H * O)
    bytes_accessed = 4 * (x1.size + x2.size + w1a.size + w1b.size
                          + b1.size + w2.size + b2.size + B * O)

    out = pl.pallas_call(
        _siamese_head_kernel,
        out_shape=jax.ShapeDtypeStruct((B, O), jnp.float32),
        grid=grid,
        in_specs=[
            pl.BlockSpec((TB, D), lambda i: (i, 0)),   # x1: tiled over batch
            pl.BlockSpec((TB, D), lambda i: (i, 0)),   # x2: tiled over batch
            pl.BlockSpec((D, H), lambda i: (0, 0)),    # w1a: resident
            pl.BlockSpec((D, H), lambda i: (0, 0)),    # w1b: resident
            pl.BlockSpec((1, H), lambda i: (0, 0)),    # b1:  resident
            pl.BlockSpec((H, O), lambda i: (0, 0)),    # w2:  resident
            pl.BlockSpec((1, O), lambda i: (0, 0)),    # b2:  resident
        ],
        out_specs=pl.BlockSpec((TB, O), lambda i: (i, 0)),
        compiler_params=pltpu.CompilerParams(
            dimension_semantics=("parallel",),
            vmem_limit_bytes=32 * 1024 * 1024,
        ),
        cost_estimate=pl.CostEstimate(
            flops=flops, transcendentals=0, bytes_accessed=bytes_accessed),
    )(x1, x2, w1a, w1b, b1, w2, b2)

    return out


def _reference(x1, x2, w1a, w1b, b1, w2, b2):
    h = x1 @ w1a + x2 @ w1b + b1
    h = jnp.maximum(h, 0.0)
    return h @ w2 + b2


if __name__ == "__main__":
    B, D, H, O = 256, 32, 32, 16   # 256 rows -> 2 parallel grid steps

    key = jax.random.PRNGKey(0)
    k_x1, k_x2, k_w1a, k_w1b, k_b1, k_w2, k_b2 = jax.random.split(key, 7)

    # two siamese-branch embeddings
    x1 = jax.random.normal(k_x1, (B, D), dtype=jnp.float32)
    x2 = jax.random.normal(k_x2, (B, D), dtype=jnp.float32)

    # synthetic parameters (layers[0] Linear(2D->H) split into x1/x2 halves;
    # layers[2] Linear(H->O))
    w1a = jax.random.normal(k_w1a, (D, H), dtype=jnp.float32) * 0.1
    w1b = jax.random.normal(k_w1b, (D, H), dtype=jnp.float32) * 0.1
    b1 = jax.random.normal(k_b1, (1, H), dtype=jnp.float32) * 0.1
    w2 = jax.random.normal(k_w2, (H, O), dtype=jnp.float32) * 0.1
    b2 = jax.random.normal(k_b2, (1, O), dtype=jnp.float32) * 0.1

    out = two_input_sequential(x1, x2, w1a, w1b, b1, w2, b2)
    out = jax.block_until_ready(out)

    ref = _reference(x1, x2, w1a, w1b, b1, w2, b2)
    assert out.shape == (B, O)
    assert out.dtype == jnp.float32
    # f32 end-to-end now -> tight tolerance vs the f32 reference.
    assert jnp.allclose(out, ref, atol=1e-2, rtol=1e-2), (
        float(jnp.max(jnp.abs(out - ref))))

    print("KERNEL_OK")
</pallas_src>

<mosaic_0001>
module attributes {stable_mosaic.version = 11 : i64} {
  func.func @_siamese_head_kernel(%arg0: i32, %arg1: memref<128x32xf32, #tpu.memory_space<vmem>>, %arg2: memref<128x32xf32, #tpu.memory_space<vmem>>, %arg3: memref<32x32xf32, #tpu.memory_space<vmem>>, %arg4: memref<32x32xf32, #tpu.memory_space<vmem>>, %arg5: memref<1x32xf32, #tpu.memory_space<vmem>>, %arg6: memref<32x16xf32, #tpu.memory_space<vmem>>, %arg7: memref<1x16xf32, #tpu.memory_space<vmem>>, %arg8: memref<128x16xf32, #tpu.memory_space<vmem>>) attributes {dimension_semantics = [#tpu.dimension_semantics<parallel>], iteration_bounds = array<i64: 2>, scalar_prefetch = 0 : i64, scratch_operands = 0 : i64, tpu.core_type = #tpu.core_type<tc>, window_params = [{transform_indices = @transform_0, window_bounds = array<i64: 128, 32>}, {transform_indices = @transform_1, window_bounds = array<i64: 128, 32>}, {pipeline_mode = #tpu.pipeline_mode<synchronous>, transform_indices = @transform_2, window_bounds = array<i64: 32, 32>}, {pipeline_mode = #tpu.pipeline_mode<synchronous>, transform_indices = @transform_3, window_bounds = array<i64: 32, 32>}, {pipeline_mode = #tpu.pipeline_mode<synchronous>, transform_indices = @transform_4, window_bounds = array<i64: 1, 32>}, {pipeline_mode = #tpu.pipeline_mode<synchronous>, transform_indices = @transform_5, window_bounds = array<i64: 32, 16>}, {pipeline_mode = #tpu.pipeline_mode<synchronous>, transform_indices = @transform_6, window_bounds = array<i64: 1, 16>}, {transform_indices = @transform_7, window_bounds = array<i64: 128, 16>}]} {
    %c0 = arith.constant 0 : index
    %c0_0 = arith.constant 0 : index
    %0 = vector.load %arg1[%c0, %c0_0] : memref<128x32xf32, #tpu.memory_space<vmem>>, vector<128x32xf32>
    %c0_1 = arith.constant 0 : index
    %c0_2 = arith.constant 0 : index
    %1 = vector.load %arg3[%c0_1, %c0_2] : memref<32x32xf32, #tpu.memory_space<vmem>>, vector<32x32xf32>
    %cst = arith.constant dense<0.000000e+00> : vector<128x32xf32>
    %2 = tpu.matmul %0, %1, %cst {dimension_numbers = #tpu.dot_dimension_numbers<[1], [0], [0], [1], [0, 0, 1, 1], [], []>} : vector<128x32xf32>, vector<32x32xf32>, vector<128x32xf32> -> vector<128x32xf32>
    %c0_3 = arith.constant 0 : index
    %c0_4 = arith.constant 0 : index
    %3 = vector.load %arg2[%c0_3, %c0_4] : memref<128x32xf32, #tpu.memory_space<vmem>>, vector<128x32xf32>
    %c0_5 = arith.constant 0 : index
    %c0_6 = arith.constant 0 : index
    %4 = vector.load %arg4[%c0_5, %c0_6] : memref<32x32xf32, #tpu.memory_space<vmem>>, vector<32x32xf32>
    %cst_7 = arith.constant dense<0.000000e+00> : vector<128x32xf32>
    %5 = tpu.matmul %3, %4, %cst_7 {dimension_numbers = #tpu.dot_dimension_numbers<[1], [0], [0], [1], [0, 0, 1, 1], [], []>} : vector<128x32xf32>, vector<32x32xf32>, vector<128x32xf32> -> vector<128x32xf32>
    %6 = arith.addf %2, %5 : vector<128x32xf32>
    %c0_8 = arith.constant 0 : index
    %c0_9 = arith.constant 0 : index
    %7 = vector.load %arg5[%c0_8, %c0_9] : memref<1x32xf32, #tpu.memory_space<vmem>>, vector<1x32xf32>
    %8 = vector.broadcast %7 : vector<1x32xf32> to vector<128x32xf32>
    %9 = arith.addf %6, %8 : vector<128x32xf32>
    %cst_10 = arith.constant 0.000000e+00 : f32
    %10 = vector.broadcast %cst_10 : f32 to vector<128x32xf32>
    %11 = arith.maximumf %9, %10 : vector<128x32xf32>
    %c0_11 = arith.constant 0 : index
    %c0_12 = arith.constant 0 : index
    %12 = vector.load %arg6[%c0_11, %c0_12] : memref<32x16xf32, #tpu.memory_space<vmem>>, vector<32x16xf32>
    %cst_13 = arith.constant dense<0.000000e+00> : vector<128x16xf32>
    %13 = tpu.matmul %11, %12, %cst_13 {dimension_numbers = #tpu.dot_dimension_numbers<[1], [0], [0], [1], [0, 0, 1, 1], [], []>} : vector<128x32xf32>, vector<32x16xf32>, vector<128x16xf32> -> vector<128x16xf32>
    %c0_14 = arith.constant 0 : index
    %c0_15 = arith.constant 0 : index
    %14 = vector.load %arg7[%c0_14, %c0_15] : memref<1x16xf32, #tpu.memory_space<vmem>>, vector<1x16xf32>
    %15 = vector.broadcast %14 : vector<1x16xf32> to vector<128x16xf32>
    %16 = arith.addf %13, %15 : vector<128x16xf32>
    %c0_16 = arith.constant 0 : index
    %c0_17 = arith.constant 0 : index
    %17 = vector.load %arg8[%c0_16, %c0_17] : memref<128x16xf32, #tpu.memory_space<vmem>>, vector<128x16xf32>
    tpu.vector_store %arg8[%c0_16, %c0_17], %16 {strides = array<i32>} : memref<128x16xf32, #tpu.memory_space<vmem>>, vector<128x16xf32>,
    return
  }
  func.func @transform_0(%arg0: i32) -> (i32, i32) {
    %c0_i32 = arith.constant 0 : i32
    %c0_i32_0 = arith.constant 0 : i32
    return %arg0, %c0_i32 : i32, i32
  }
  func.func @transform_1(%arg0: i32) -> (i32, i32) {
    %c0_i32 = arith.constant 0 : i32
    %c0_i32_0 = arith.constant 0 : i32
    return %arg0, %c0_i32 : i32, i32
  }
  func.func @transform_2(%arg0: i32) -> (i32, i32) {
    %c0_i32 = arith.constant 0 : i32
    %c0_i32_0 = arith.constant 0 : i32
    %c0_i32_1 = arith.constant 0 : i32
    return %c0_i32, %c0_i32_0 : i32, i32
  }
  func.func @transform_3(%arg0: i32) -> (i32, i32) {
    %c0_i32 = arith.constant 0 : i32
    %c0_i32_0 = arith.constant 0 : i32
    %c0_i32_1 = arith.constant 0 : i32
    return %c0_i32, %c0_i32_0 : i32, i32
  }
  func.func @transform_4(%arg0: i32) -> (i32, i32) {
    %c0_i32 = arith.constant 0 : i32
    %c0_i32_0 = arith.constant 0 : i32
    %c0_i32_1 = arith.constant 0 : i32
    return %c0_i32, %c0_i32_0 : i32, i32
  }
  func.func @transform_5(%arg0: i32) -> (i32, i32) {
    %c0_i32 = arith.constant 0 : i32
    %c0_i32_0 = arith.constant 0 : i32
    %c0_i32_1 = arith.constant 0 : i32
    return %c0_i32, %c0_i32_0 : i32, i32
  }
  func.func @transform_6(%arg0: i32) -> (i32, i32) {
    %c0_i32 = arith.constant 0 : i32
    %c0_i32_0 = arith.constant 0 : i32
    %c0_i32_1 = arith.constant 0 : i32
    return %c0_i32, %c0_i32_0 : i32, i32
  }
  func.func @transform_7(%arg0: i32) -> (i32, i32) {
    %c0_i32 = arith.constant 0 : i32
    %c0_i32_0 = arith.constant 0 : i32
    return %arg0, %c0_i32 : i32, i32
  }
}

</mosaic_0001>

<bundles_post_ra>
// kernel: tpu_custom_call.1
= control target key start
LH: loop header
LB: loop body
LE: loop exit
PB: predicated region body
PF: predicated region fallthrough
CT: control target
= control target key end

     0   :  { %s1378_s24 = smov 0   ;;  %s1581_s0 = inlined_call_operand.vmem [shape: f32[256,32], index: 0, kind: input, shape index: {}]   ;;  %s1582_s1 = inlined_call_operand.vmem [shape: f32[256,32], index: 1, kind: input, shape index: {}]   ;;  %s1583_s2 = inlined_call_operand.vmem [shape: f32[32,32], index: 2, kind: input, shape index: {}]   ;;  %s1584_s3 = inlined_call_operand.vmem [shape: f32[32,32], index: 3, kind: input, shape index: {}]   ;;  %s1585_s4 = inlined_call_operand.vmem [shape: f32[1,32], index: 4, kind: input, shape index: {}]   ;;  %s1586_s5 = inlined_call_operand.vmem [shape: f32[32,16], index: 5, kind: input, shape index: {}]   ;;  %s1587_s6 = inlined_call_operand.vmem [shape: f32[1,16], index: 6, kind: input, shape index: {}]   ;;  %s1588_s7 = inlined_call_operand.vmem [shape: f32[256,16], index: 7, kind: output, shape index: {}]  }
   0x1 LB: > { %s1059_s25 = sadd.s32 4294967295, %s1336_s24   ;;  %p1063_p0 = scmp.ge.s32.totalorder %s1336_s24, 1  ;;  %s1336_s24 = sphi %s1378_s24, %s17_s24  }
   0x2   : > { %p249_p1 = scmp.lt.s32.totalorder %s1336_s24, 3 }
   0x4   : > { %p250_p2 = pnand %p1063_p0, %p249_p1 }
   0x5   : > { %v340_v0 = vld [vmem:[%s1584_s3] sm:$0xff] (!%p250_p2)  ;;  %v341_v1 = vld [vmem:[%s1584_s3 + $0x8] sm:$0xff] (!%p250_p2)  ;;  %v342_v2 = vld [vmem:[%s1584_s3 + $0x10] sm:$0xff] (!%p250_p2)  ;;  %s1064_s9 = sshll.u32 (!%p250_p2), %s1059_s25, 4  ;;  %vm344_vm0 = vcmask (!%p250_p2), 261120   ;;  %vm974_vm1 = vcmask (!%p250_p2), 130048  }
   0x6   : > { %253 = sbr.rel (%p250_p2) target bundleno = 498 (0x1f2), region = 48  ;;  %v1278_v3 = vpack.c.bf16 (!%p250_p2), %v341_v1, %v340_v0  ;;  %v343_v4 = vld [vmem:[%s1584_s3 + $0x18] sm:$0xff] (!%p250_p2)  ;;  %p287_p3 = scmp.lt.s32.totalorder (!%p250_p2), %s1064_s9, 31  ;;  %v320_v6 = vld [vmem:[%s1583_s2] sm:$0xff] (!%p250_p2)  ;;  %v321_v7 = vld [vmem:[%s1583_s2 + $0x8] sm:$0xff] (!%p250_p2) }
   0x7   : > { %v1282_v5 = vpack.c.bf16 (!%p250_p2), %v343_v4, %v342_v2  ;;  %v770_v8 = vld [vmem:[%s1586_s5] sm:$0xff] (!%p250_p2)  ;;  %v771_v9 = vld [vmem:[%s1586_s5 + $0x8] sm:$0xff] (!%p250_p2)  ;;  %v1286_v10 = vpack.c.bf16 (!%p250_p2), %v321_v7, %v320_v6  ;;  %v322_v11 = vld [vmem:[%s1583_s2 + $0x10] sm:$0xff] (!%p250_p2) }
   0x8   : > { %1279 = vmatprep.subr.bf16.mxu0 (!%p250_p2), %v1278_v3  ;;  %1302 = vmatprep.subr.bf16.mxu1 (!%p250_p2), %v1278_v3  ;;  %v323_v12 = vld [vmem:[%s1583_s2 + $0x18] sm:$0xff] (!%p250_p2)  ;;  %v1294_v13 = vpack.c.bf16 (!%p250_p2), %v771_v9, %v770_v8  ;;  %v772_v47 = vld [vmem:[%s1586_s5 + $0x10] sm:$0xff] (!%p250_p2)  ;;  %v1503_v56 = vld [vmem:[%s1585_s4] ss:$0 sm:$0xff] (!%p250_p2) }
   0x9   : > { %1281 = vmatpush3.bf16.msra.mxu0 (!%p250_p2), %v1278_v3  ;;  %1304 = vmatpush3.bf16.msra.mxu1 (!%p250_p2), %v1278_v3  ;;  %v1290_v17 = vpack.c.bf16 (!%p250_p2), %v323_v12, %v322_v11  ;;  %v773_v48 = vld [vmem:[%s1586_s5 + $0x18] sm:$0xff] (!%p250_p2) }
   0xa   : > { %1283 = vmatprep.subr.bf16.mxu0 (!%p250_p2), %v1282_v5  ;;  %1303 = vmatprep.subr.bf16.mxu1 (!%p250_p2), %v1282_v5  ;;  %v1298_v49 = vpack.c.bf16 (!%p250_p2), %v773_v48, %v772_v47 }
   0xd   : > { %s1590_s9 = smov (!%p287_p3, %s1064_s9), 31  ;;  %1285 = vmatpush3.bf16.msra.mxu0 %v1282_v5  ;;  %1305 = vmatpush3.bf16.msra.mxu1 %v1282_v5 }
   0xe   : > { %s1410_s20 = sshll.u32 %s1590_s9, 3  ;;  %1287 = vmatprep.subr.bf16.mxu0 %v1286_v10  ;;  %1295 = vmatprep.subr.bf16.mxu1 %v1294_v13 }
   0xf   : > { %s1416_s23 = scalar_lea.vmem %s1582_s1, %s1410_s20  ;;  %s1448_s8 = scalar_lea.vmem %s1581_s0, %s1410_s20 }
  0x10   : > { %v324_v14 = vld [vmem:[%s1416_s23] sm:$0xff]  ;;  %v325_v15 = vld [vmem:[%s1416_s23 + $0x8] sm:$0xff]  ;;  %v326_v16 = vld [vmem:[%s1416_s23 + $0x10] sm:$0xff]  ;;  %s1544_s19 = scalar_lea.vmem %s1588_s7, %s1410_s20 }
  0x11   : > { %1190 = vmatprep.mubr.msk.f32.mxu0 %vm344_vm0, %v324_v14  ;;  %v327_v18 = vld [vmem:[%s1416_s23 + $0x18] sm:$0xff]  ;;  %v332_v19 = vld [vmem:[%s1416_s23 + $0x40] sm:$0xff]  ;;  %v333_v21 = vld [vmem:[%s1416_s23 + $0x48] sm:$0xff] }
  0x12   : > { %1191 = vmatmul.mubr.msk.f32.vlgmr.msra.gmra.mrb[0].mxu0 %vm344_vm0, %v325_v15  ;;  %v328_v20 = vld [vmem:[%s1416_s23 + $0x20] sm:$0xff]  ;;  %1202 = vmatprep.mubr.msk.f32.mxu1 %vm344_vm0, %v332_v19  ;;  %v334_v22 = vld [vmem:[%s1416_s23 + $0x50] sm:$0xff]  ;;  %v335_v23 = vld [vmem:[%s1416_s23 + $0x58] sm:$0xff] }
  0x13   : > { %1289 = vmatpush3.bf16.msra.mxu0 %v1286_v10  ;;  %1193 = vmatprep.mubr.msk.f32.mxu0 %vm344_vm0, %v326_v16  ;;  %v329_v24 = vld [vmem:[%s1416_s23 + $0x28] sm:$0xff]  ;;  %v336_v25 = vld [vmem:[%s1416_s23 + $0x60] sm:$0xff]  ;;  %v330_v26 = vld [vmem:[%s1416_s23 + $0x30] sm:$0xff] }
  0x14   : > { %1291 = vmatprep.subr.bf16.mxu0 %v1290_v17  ;;  %1203 = vmatmul.mubr.msk.f32.vlgmr.msra.gmra.mrb[0].mxu1 %vm344_vm0, %v333_v21  ;;  %v337_v27 = vld [vmem:[%s1416_s23 + $0x68] sm:$0xff]  ;;  %v331_v28 = vld [vmem:[%s1416_s23 + $0x38] sm:$0xff]  ;;  %v338_v29 = vld [vmem:[%s1416_s23 + $0x70] sm:$0xff] }
  0x15   : > { %1205 = vmatprep.mubr.msk.f32.mxu1 %vm344_vm0, %v334_v22  ;;  %1297 = vmatpush3.bf16.msra.mxu1 %v1294_v13  ;;  %v304_v30 = vld [vmem:[%s1448_s8] sm:$0xff]  ;;  %v339_v31 = vld [vmem:[%s1416_s23 + $0x78] sm:$0xff]  ;;  %v305_v32 = vld [vmem:[%s1448_s8 + $0x8] sm:$0xff] }
  0x16   : > { %1194 = vmatmul.mubr.msk.f32.gmra.mrb[2].mxu0 %vm344_vm0, %v327_v18  ;;  %v306_v33 = vld [vmem:[%s1448_s8 + $0x10] sm:$0xff]  ;;  %v307_v34 = vld [vmem:[%s1448_s8 + $0x18] sm:$0xff]  ;;  %v308_v35 = vld [vmem:[%s1448_s8 + $0x20] sm:$0xff]  ;;  %1299 = vmatprep.subr.bf16.mxu1 %v1298_v49 }
  0x17   : > { %1196 = vmatprep.mubr.msk.f32.mxu0 %vm344_vm0, %v328_v20  ;;  %1293 = vmatpush3.bf16.msra.mxu0 %v1290_v17  ;;  %v309_v36 = vld [vmem:[%s1448_s8 + $0x28] sm:$0xff]  ;;  %v310_v37 = vld [vmem:[%s1448_s8 + $0x30] sm:$0xff]  ;;  %v311_v38 = vld [vmem:[%s1448_s8 + $0x38] sm:$0xff] }
  0x18   : > { %1206 = vmatmul.mubr.msk.f32.gmra.mrb[2].mxu1 %vm344_vm0, %v335_v23  ;;  %v312_v39 = vld [vmem:[%s1448_s8 + $0x40] sm:$0xff]  ;;  %v313_v40 = vld [vmem:[%s1448_s8 + $0x48] sm:$0xff]  ;;  %v314_v41 = vld [vmem:[%s1448_s8 + $0x50] sm:$0xff] }
  0x19   : > { %1208 = vmatprep.mubr.msk.f32.mxu1 %vm344_vm0, %v336_v25  ;;  %v315_v42 = vld [vmem:[%s1448_s8 + $0x58] sm:$0xff]  ;;  %v316_v43 = vld [vmem:[%s1448_s8 + $0x60] sm:$0xff]  ;;  %v317_v44 = vld [vmem:[%s1448_s8 + $0x68] sm:$0xff]  ;;  %1301 = vmatpush3.bf16.msra.mxu1 %v1298_v49 }
  0x1a   : > { %1197 = vmatmul.mubr.msk.f32.gmra.mrb[4].mxu0 %vm344_vm0, %v329_v24  ;;  %v318_v45 = vld [vmem:[%s1448_s8 + $0x70] sm:$0xff]  ;;  %v319_v46 = vld [vmem:[%s1448_s8 + $0x78] sm:$0xff] }
  0x1b   : > { %1199 = vmatprep.mubr.msk.f32.mxu0 %vm344_vm0, %v330_v26 }
  0x1c   : > { %1209 = vmatmul.mubr.msk.f32.gmra.mrb[4].mxu1 %vm344_vm0, %v337_v27 }
  0x1d   : > { %1211 = vmatprep.mubr.msk.f32.mxu1 %vm344_vm0, %v338_v29 }
  0x1e   : > { %1200 = vmatmul.mubr.msk.f32.gmra.mrb[6].mxu0 %vm344_vm0, %v331_v28 }
  0x1f   : > { %1222 = vmatprep.mubr.msk.f32.mxu0 %vm344_vm0, %v304_v30 }
  0x20   : > { %1212 = vmatmul.mubr.msk.f32.gmra.mrb[6].mxu1 %vm344_vm0, %v339_v31 }
  0x22   : > { %1223 = vmatmul.mubr.msk.f32.vlgmr.msra.gmra.mrb[0].mxu0 %vm344_vm0, %v305_v32 }
  0x23   : > { %1225 = vmatprep.mubr.msk.f32.mxu0 %vm344_vm0, %v306_v33 }
  0x26   : > { %1226 = vmatmul.mubr.msk.f32.gmra.mrb[2].mxu0 %vm344_vm0, %v307_v34 }
  0x27   : > { %1228 = vmatprep.mubr.msk.f32.mxu0 %vm344_vm0, %v308_v35 }
  0x2a   : > { %1229 = vmatmul.mubr.msk.f32.gmra.mrb[4].mxu0 %vm344_vm0, %v309_v36 }
  0x2b   : > { %1231 = vmatprep.mubr.msk.f32.mxu0 %vm344_vm0, %v310_v37 }
  0x2e   : > { %1232 = vmatmul.mubr.msk.f32.gmra.mrb[6].mxu0 %vm344_vm0, %v311_v38 }
  0x2f   : > { %1234 = vmatprep.mubr.msk.f32.mxu0 %vm344_vm0, %v312_v39 }
  0x32   : > { %1235 = vmatmul.mubr.msk.f32.gmra.mrb[8].mxu0 %vm344_vm0, %v313_v40 }
  0x33   : > { %1237 = vmatprep.mubr.msk.f32.mxu0 %vm344_vm0, %v314_v41 }
  0x36   : > { %1238 = vmatmul.mubr.msk.f32.gmra.mrb[10].mxu0 %vm344_vm0, %v315_v42 }
  0x37   : > { %1240 = vmatprep.mubr.msk.f32.mxu0 %vm344_vm0, %v316_v43 }
  0x3a   : > { %1241 = vmatmul.mubr.msk.f32.gmra.mrb[12].mxu0 %vm344_vm0, %v317_v44 }
  0x3b   : > { %1243 = vmatprep.mubr.msk.f32.mxu0 %vm344_vm0, %v318_v45 }
  0x3e   : > { %1244 = vmatmul.mubr.msk.f32.gmra.mrb[14].mxu0 %vm344_vm0, %v319_v46 }
  0xe7   : > { %v1204_v50 = vpop.f32.mrb[0].mxu1 }
  0xe8   : > { %v499_v51 = vpop.f32.mrb[1].mxu1 }
  0xeb   : > { %v1207_v52 = vpop.f32.mrb[2].mxu1 }
  0xec   : > { %v509_v53 = vpop.f32.mrb[3].mxu1 }
  0xef   : > { %v1210_v54 = vpop.f32.mrb[4].mxu1 }
  0xf0   : > { %v519_v55 = vpop.f32.mrb[5].mxu1 }
  0xf3   : > { %v1213_v57 = vpop.f32.mrb[6].mxu1 }
  0xf4   : > { %v529_v59 = vpop.f32.mrb[7].mxu1 }
  0xf5   : > { %v1224_v58 = vpop.f32.mrb[0].mxu0 }
  0xf6   : > { %v739_v60 = vadd.f32 %v1224_v58, %v1503_v56  ;;  %v652_v61 = vpop.f32.mrb[1].mxu0 }
  0xf7   : > { %v738_v62 = vadd.f32 %v1503_v56, %v652_v61 }
  0xf8   : > { %v755_v1 = vmax.f32 %v739_v60, 0.0 }
  0xf9   : > { %v754_v63 = vmax.f32 %v738_v62, 0.0  ;;  %v1227_v0 = vpop.f32.mrb[2].mxu0 }
  0xfa   : > { %v741_v2 = vadd.f32 %v1227_v0, %v1503_v56  ;;  %v662_v3 = vpop.f32.mrb[3].mxu0 }
  0xfb   : > { %v740_v4 = vadd.f32 %v1503_v56, %v662_v3  ;;  %1254 = vmatprep.mubr.msk.f32.mxu1 %vm344_vm0, %v754_v63 }
  0xfc   : > { %1255 = vmatmul.mubr.msk.f32.vlgmr.msra.gmra.mrb[8].mxu1 %vm344_vm0, %v755_v1  ;;  %v757_v7 = vmax.f32 %v741_v2, 0.0 }
  0xfd   : > { %v756_v5 = vmax.f32 %v740_v4, 0.0  ;;  %v1230_v6 = vpop.f32.mrb[4].mxu0 }
  0xfe   : > { %v743_v8 = vadd.f32 %v1230_v6, %v1503_v56  ;;  %v672_v9 = vpop.f32.mrb[5].mxu0 }
  0xff   : > { %v742_v10 = vadd.f32 %v1503_v56, %v672_v9  ;;  %1257 = vmatprep.mubr.msk.f32.mxu1 %vm344_vm0, %v756_v5 }
 0x100   : > { %1258 = vmatmul.mubr.msk.f32.gmra.mrb[10].mxu1 %vm344_vm0, %v757_v7  ;;  %v759_v13 = vmax.f32 %v743_v8, 0.0 }
 0x101   : > { %v758_v11 = vmax.f32 %v742_v10, 0.0  ;;  %v1233_v12 = vpop.f32.mrb[6].mxu0 }
 0x102   : > { %v745_v14 = vadd.f32 %v1233_v12, %v1503_v56  ;;  %v682_v15 = vpop.f32.mrb[7].mxu0 }
 0x103   : > { %v744_v16 = vadd.f32 %v1503_v56, %v682_v15  ;;  %1260 = vmatprep.mubr.msk.f32.mxu1 %vm344_vm0, %v758_v11 }
 0x104   : > { %1261 = vmatmul.mubr.msk.f32.gmra.mrb[12].mxu1 %vm344_vm0, %v759_v13  ;;  %v761_v19 = vmax.f32 %v745_v14, 0.0 }
 0x105   : > { %v760_v17 = vmax.f32 %v744_v16, 0.0  ;;  %v1236_v18 = vpop.f32.mrb[8].mxu0 }
 0x106   : > { %v698_v20 = vadd.f32 %v1236_v18, %v1204_v50  ;;  %v692_v21 = vpop.f32.mrb[9].mxu0 }
 0x107   : > { %v693_v22 = vadd.f32 %v692_v21, %v499_v51  ;;  %1263 = vmatprep.mubr.msk.f32.mxu1 %vm344_vm0, %v760_v17  ;;  %v1103_v51 = vld [vmem:[%s1587_s6] ss:$0 sm:$0xff] }
 0x108   : > { %v747_v23 = vadd.f32 %v1503_v56, %v698_v20  ;;  %1264 = vmatmul.mubr.msk.f32.gmra.mrb[14].mxu1 %vm344_vm0, %v761_v19 }
 0x109   : > { %v746_v24 = vadd.f32 %v1503_v56, %v693_v22  ;;  %v1239_v25 = vpop.f32.mrb[10].mxu0 }
 0x10a   : > { %v708_v26 = vadd.f32 %v1239_v25, %v1207_v52  ;;  %v702_v27 = vpop.f32.mrb[11].mxu0  ;;  %v763_v30 = vmax.f32 %v747_v23, 0.0 }
 0x10b   : > { %v762_v28 = vmax.f32 %v746_v24, 0.0  ;;  %v703_v29 = vadd.f32 %v702_v27, %v509_v53 }
 0x10c   : > { %v749_v31 = vadd.f32 %v1503_v56, %v708_v26 }
 0x10d   : > { %v748_v32 = vadd.f32 %v1503_v56, %v703_v29  ;;  %v1242_v33 = vpop.f32.mrb[12].mxu0  ;;  %1266 = vmatprep.mubr.msk.f32.mxu1 %vm344_vm0, %v762_v28 }
 0x10e   : > { %v718_v34 = vadd.f32 %v1242_v33, %v1210_v54  ;;  %v712_v35 = vpop.f32.mrb[13].mxu0  ;;  %1267 = vmatmul.mubr.msk.f32.gmra.mrb[16].mxu1 %vm344_vm0, %v763_v30  ;;  %v765_v38 = vmax.f32 %v749_v31, 0.0 }
 0x10f   : > { %v764_v36 = vmax.f32 %v748_v32, 0.0  ;;  %v713_v37 = vadd.f32 %v712_v35, %v519_v55 }
 0x110   : > { %v751_v39 = vadd.f32 %v1503_v56, %v718_v34 }
 0x111   : > { %v750_v40 = vadd.f32 %v1503_v56, %v713_v37  ;;  %v1245_v41 = vpop.f32.mrb[14].mxu0  ;;  %1269 = vmatprep.mubr.msk.f32.mxu1 %vm344_vm0, %v764_v36 }
 0x112   : > { %v728_v42 = vadd.f32 %v1245_v41, %v1213_v57  ;;  %v722_v43 = vpop.f32.mrb[15].mxu0  ;;  %1270 = vmatmul.mubr.msk.f32.gmra.mrb[18].mxu1 %vm344_vm0, %v765_v38  ;;  %v767_v46 = vmax.f32 %v751_v39, 0.0 }
 0x113   : > { %v766_v44 = vmax.f32 %v750_v40, 0.0  ;;  %v723_v45 = vadd.f32 %v722_v43, %v529_v59 }
 0x114   : > { %v753_v47 = vadd.f32 %v1503_v56, %v728_v42 }
 0x115   : > { %v752_v48 = vadd.f32 %v1503_v56, %v723_v45  ;;  %1272 = vmatprep.mubr.msk.f32.mxu1 %vm344_vm0, %v766_v44 }
 0x116   : > { %1273 = vmatmul.mubr.msk.f32.gmra.mrb[20].mxu1 %vm344_vm0, %v767_v46  ;;  %v769_v50 = vmax.f32 %v753_v47, 0.0 }
 0x117   : > { %v768_v49 = vmax.f32 %v752_v48, 0.0 }
 0x119   : > { %1275 = vmatprep.mubr.msk.f32.mxu1 %vm344_vm0, %v768_v49 }
 0x11a   : > { %1276 = vmatmul.mubr.msk.f32.gmra.mrb[22].mxu1 %vm344_vm0, %v769_v50 }
 0x1cf   : > { %v1256_v52 = vpop.f32.mrb[8].mxu1 }
 0x1d0   : > { %v901_v53 = vadd.f32 %v1256_v52, %v1103_v51  ;;  %v895_v54 = vpop.f32.mrb[9].mxu1 }
 0x1d1   : > { %v896_v55 = vadd.f32 %v1103_v51, %v895_v54 }
 0x1d2   : > { %976 = vst.msk [vmem:[%s1544_s19 + $0x8] sm:$0xff] %vm974_vm1, %v901_v53 }
 0x1d3   : > { %975 = vst.msk [vmem:[%s1544_s19] sm:$0xff] %vm974_vm1, %v896_v55  ;;  %v1259_v56 = vpop.f32.mrb[10].mxu1 }
 0x1d4   : > { %v911_v57 = vadd.f32 %v1259_v56, %v1103_v51  ;;  %v905_v58 = vpop.f32.mrb[11].mxu1 }
 0x1d5   : > { %v906_v59 = vadd.f32 %v1103_v51, %v905_v58 }
 0x1d6   : > { %978 = vst.msk [vmem:[%s1544_s19 + $0x18] sm:$0xff] %vm974_vm1, %v911_v57 }
 0x1d7   : > { %977 = vst.msk [vmem:[%s1544_s19 + $0x10] sm:$0xff] %vm974_vm1, %v906_v59  ;;  %v1262_v60 = vpop.f32.mrb[12].mxu1 }
 0x1d8   : > { %v921_v61 = vadd.f32 %v1262_v60, %v1103_v51  ;;  %v915_v62 = vpop.f32.mrb[13].mxu1 }
 0x1d9   : > { %v916_v63 = vadd.f32 %v1103_v51, %v915_v62 }
 0x1da   : > { %980 = vst.msk [vmem:[%s1544_s19 + $0x28] sm:$0xff] %vm974_vm1, %v921_v61 }
 0x1db   : > { %979 = vst.msk [vmem:[%s1544_s19 + $0x20] sm:$0xff] %vm974_vm1, %v916_v63  ;;  %v1265_v0 = vpop.f32.mrb[14].mxu1 }
 0x1dc   : > { %v931_v1 = vadd.f32 %v1265_v0, %v1103_v51  ;;  %v925_v2 = vpop.f32.mrb[15].mxu1 }
 0x1dd   : > { %v926_v3 = vadd.f32 %v1103_v51, %v925_v2 }
 0x1de   : > { %982 = vst.msk [vmem:[%s1544_s19 + $0x38] sm:$0xff] %vm974_vm1, %v931_v1 }
 0x1df   : > { %981 = vst.msk [vmem:[%s1544_s19 + $0x30] sm:$0xff] %vm974_vm1, %v926_v3 }
 0x1e1   : > { %v1268_v4 = vpop.f32.mrb[16].mxu1 }
 0x1e2   : > { %v941_v5 = vadd.f32 %v1268_v4, %v1103_v51  ;;  %v935_v6 = vpop.f32.mrb[17].mxu1 }
 0x1e3   : > { %v936_v7 = vadd.f32 %v1103_v51, %v935_v6 }
 0x1e4   : > { %984 = vst.msk [vmem:[%s1544_s19 + $0x48] sm:$0xff] %vm974_vm1, %v941_v5 }
 0x1e5   : > { %983 = vst.msk [vmem:[%s1544_s19 + $0x40] sm:$0xff] %vm974_vm1, %v936_v7  ;;  %v1271_v8 = vpop.f32.mrb[18].mxu1 }
 0x1e6   : > { %v951_v9 = vadd.f32 %v1271_v8, %v1103_v51  ;;  %v945_v10 = vpop.f32.mrb[19].mxu1 }
 0x1e7   : > { %v946_v11 = vadd.f32 %v1103_v51, %v945_v10 }
 0x1e8   : > { %986 = vst.msk [vmem:[%s1544_s19 + $0x58] sm:$0xff] %vm974_vm1, %v951_v9 }
 0x1e9   : > { %985 = vst.msk [vmem:[%s1544_s19 + $0x50] sm:$0xff] %vm974_vm1, %v946_v11  ;;  %v1274_v12 = vpop.f32.mrb[20].mxu1 }
 0x1ea   : > { %v961_v13 = vadd.f32 %v1274_v12, %v1103_v51  ;;  %v955_v14 = vpop.f32.mrb[21].mxu1 }
 0x1eb   : > { %v956_v15 = vadd.f32 %v1103_v51, %v955_v14 }
 0x1ec   : > { %988 = vst.msk [vmem:[%s1544_s19 + $0x68] sm:$0xff] %vm974_vm1, %v961_v13 }
 0x1ed   : > { %987 = vst.msk [vmem:[%s1544_s19 + $0x60] sm:$0xff] %vm974_vm1, %v956_v15  ;;  %v1277_v16 = vpop.f32.mrb[22].mxu1 }
 0x1ee   : > { %v971_v17 = vadd.f32 %v1277_v16, %v1103_v51  ;;  %v965_v18 = vpop.f32.mrb[23].mxu1 }
 0x1ef   : > { %v966_v19 = vadd.f32 %v1103_v51, %v965_v18 }
 0x1f0   : > { %990 = vst.msk [vmem:[%s1544_s19 + $0x78] sm:$0xff] %vm974_vm1, %v971_v17 }
 0x1f1   : > { %989 = vst.msk [vmem:[%s1544_s19 + $0x70] sm:$0xff] %vm974_vm1, %v966_v19 }
 0x1f2 PF: > { %s17_s24 = sadd.s32 1, %s1336_s24  }
 0x1f3   : > { %p14_p4 = scmp.ge.s32.totalorder %s17_s24, 4  }
 0x1f5   :  { %16 = sbr.rel (!%p14_p4) target bundleno = 1 (0x1), region = 81 }

</bundles_post_ra>
